<compile_context>
chip_gen: v6e
topology: v6e:2x2x1
jax: 0.10.0
libtpu: 0.0.40
codegen_flags: <defaults>
</compile_context>

<pallas_src>
import functools

import jax
import jax.numpy as jnp
from jax import lax
from jax.experimental import pallas as pl
from jax.experimental.pallas import tpu as pltpu

_EPS = 1e-8  # torch.nn.CosineSimilarity default eps


def _round_up(a, b):
    return ((a + b - 1) // b) * b


def _cos_sim_kernel(x_ref, y_ref, inv_xn_ref, inv_yn_ref, o_ref, *, inv_eps_scaled):
    """One (tm, tn) output tile of the pairwise cosine-similarity matrix."""
    # Hot path: NT matmul on the MXU, f32 accumulation, no transpose relayout.
    dots = lax.dot_general(
        x_ref[...], y_ref[...],
        dimension_numbers=(((1,), (1,)), ((), ())),
        preferred_element_type=jnp.float32,
    )  # (tm, tn) f32

    # Rank-1 scale:  1 / (max(||x||*||y||, eps) * temp)
    #            ==  min(inv_xn * inv_yn_scaled, 1/(eps*temp))   (all terms > 0).
    # Both reciprocals are exact and precomputed in the wrapper, so the
    # epilogue is a couple of VALU ops per vreg (no norms, no EUP recip).
    scale = jnp.minimum(inv_xn_ref[...] * inv_yn_ref[...], inv_eps_scaled)  # (tm, tn)
    o_ref[...] = (dots * scale).astype(o_ref.dtype)


def _similarity_impl(x, y, temp, *, tm=256, tn=256):
    """Pallas implementation of Similarity.forward for the pairwise pattern.

    x: (N, 1, H), y: (1, M, H)  ->  (N, M) float32
    (matches torch broadcasting of CosineSimilarity(dim=-1) / temp).
    """
    assert x.ndim == 3 and y.ndim == 3 and x.shape[1] == 1 and y.shape[0] == 1
    assert x.shape[-1] == y.shape[-1]
    temp = float(temp)
    assert temp > 0.0, "temp must be positive (SimCSE temperature)"

    x_rows = x[:, 0, :]          # (N, H)
    y_rows = y[0, :, :]          # (M, H)
    N, H = x_rows.shape
    M = y_rows.shape[0]
    itemsize = jnp.dtype(x_rows.dtype).itemsize

    # ---- tile selection -------------------------------------------------
    # tm multiple of 8, tn multiple of 128 (lane-dense output stores).
    tm = min(tm, _round_up(N, 8))
    tn = min(tn, _round_up(M, 128))

    def vmem_est(tm_, tn_):
        # Double-buffered inputs + rank-1 norm vectors + f32 output tile.
        return 2 * ((tm_ + tn_) * H * itemsize + (tm_ + tn_) * 4 + tm_ * tn_ * 4)

    budget = 20 * 1024 * 1024  # conservative across v5e / v6e / v7x
    while vmem_est(tm, tn) > budget and tn > 128:
        tn = max(128, _round_up(tn // 2, 128))
    while vmem_est(tm, tn) > budget and tm > 8:
        tm = max(8, _round_up(tm // 2, 8))
    # TODO(synk): for very large H, add a third "arbitrary" K grid axis with a
    # (tm, tn) f32 VMEM accumulator instead of shrinking tm/tn.

    N_pad = _round_up(N, tm)
    M_pad = _round_up(M, tn)

    # Keep >= 2 programs on a "parallel" axis when possible so v7x's second
    # TensorCore gets work (no effect on single-TC v5e/v6e).
    if N_pad // tm == 1 and M_pad // tn == 1:
        if N >= 16 and tm % 16 == 0:
            tm //= 2
            N_pad = _round_up(N, tm)
        elif M >= 256 and tn % 256 == 0:
            tn //= 2
            M_pad = _round_up(M, tn)

    if N_pad != N:
        x_rows = jnp.pad(x_rows, ((0, N_pad - N), (0, 0)))
    if M_pad != M:
        y_rows = jnp.pad(y_rows, ((0, M_pad - M), (0, 0)))

    # Hoisted, exact rank-1 reciprocals (tiny ops, fused under jit):
    #   inv_xn = 1/||x_i||,  inv_yn = 1/(||y_j|| * temp).
    # Zero rows (incl. padding) give +inf here; the kernel's min() clamp then
    # reproduces torch's max(||x||*||y||, eps) semantics exactly.
    xf = x_rows.astype(jnp.float32)
    yf = y_rows.astype(jnp.float32)
    inv_xn = (1.0 / jnp.sqrt(jnp.sum(xf * xf, axis=-1))).reshape(N_pad, 1)
    inv_yn = (1.0 / (jnp.sqrt(jnp.sum(yf * yf, axis=-1)) * temp)).reshape(1, M_pad)

    kernel = functools.partial(_cos_sim_kernel, inv_eps_scaled=1.0 / (_EPS * temp))

    grid = (N_pad // tm, M_pad // tn)
    flops = 2 * N_pad * M_pad * H
    bytes_accessed = (
        N_pad * H * itemsize                    # x streamed once (resident over j)
        + grid[0] * M_pad * H * itemsize        # y re-streamed per row tile
        + (N_pad + M_pad) * 4                   # rank-1 reciprocals
        + N_pad * M_pad * 4                     # f32 output
    )
    vmem_limit = int(min(max(3 * vmem_est(tm, tn), 32 * 1024 * 1024),
                         64 * 1024 * 1024))

    out = pl.pallas_call(
        kernel,
        out_shape=jax.ShapeDtypeStruct((N_pad, M_pad), jnp.float32),
        grid_spec=pltpu.PrefetchScalarGridSpec(
            num_scalar_prefetch=0,
            grid=grid,
            in_specs=[
                pl.BlockSpec((tm, H), lambda i, j: (i, 0)),   # x row tile
                pl.BlockSpec((tn, H), lambda i, j: (j, 0)),   # y row tile
                pl.BlockSpec((tm, 1), lambda i, j: (i, 0)),   # 1/||x||
                pl.BlockSpec((1, tn), lambda i, j: (0, j)),   # 1/(||y||*temp)
            ],
            out_specs=pl.BlockSpec((tm, tn), lambda i, j: (i, j)),
        ),
        compiler_params=pltpu.CompilerParams(
            dimension_semantics=("parallel", "parallel"),
            vmem_limit_bytes=vmem_limit,
        ),
        cost_estimate=pl.CostEstimate(
            flops=flops, transcendentals=0, bytes_accessed=bytes_accessed),
    )(x_rows, y_rows, inv_xn, inv_yn)

    return out[:N, :M]


# jit the whole wrapper so the (cheap) pad + norm prologue fuses/overlaps with
# surrounding work; temp and tile sizes are static (compile-time) arguments.
similarity = jax.jit(_similarity_impl, static_argnums=(2,),
                     static_argnames=("tm", "tn"))


if __name__ == "__main__":
    key = jax.random.PRNGKey(0)
    kx, ky = jax.random.split(key)

    N, M, H = 8, 8, 32
    temp = 0.05  # SimCSE default temperature

    x = jax.random.normal(kx, (N, 1, H), dtype=jnp.float32)
    y = jax.random.normal(ky, (1, M, H), dtype=jnp.float32)

    out = similarity(x, y, temp)
    out = jax.block_until_ready(out)

    # Pure-JAX reference mirroring torch.nn.CosineSimilarity(dim=-1)(x, y)/temp.
    xb = jnp.broadcast_to(x, (N, M, H)).astype(jnp.float32)
    yb = jnp.broadcast_to(y, (N, M, H)).astype(jnp.float32)
    num = jnp.sum(xb * yb, axis=-1)
    den = jnp.maximum(
        jnp.linalg.norm(xb, axis=-1) * jnp.linalg.norm(yb, axis=-1), _EPS
    )
    ref = num / den / temp

    assert out.shape == ref.shape
    # The division path is now exact (rank-1 reciprocals, no approx recip);
    # atol budgets for the MXU's possible reduced-precision f32 matmul passes.
    assert jnp.allclose(out, ref, atol=5e-2, rtol=2e-3), "mismatch vs reference"

    print("KERNEL_OK")
</pallas_src>

<mosaic_0001>
module attributes {stable_mosaic.version = 11 : i64} {
  func.func @_cos_sim_kernel(%arg0: i32, %arg1: i32, %arg2: memref<8x32xf32, #tpu.memory_space<vmem>>, %arg3: memref<128x32xf32, #tpu.memory_space<vmem>>, %arg4: memref<8x1xf32, #tpu.memory_space<vmem>>, %arg5: memref<1x128xf32, #tpu.memory_space<vmem>>, %arg6: memref<8x128xf32, #tpu.memory_space<vmem>>) attributes {dimension_semantics = [#tpu.dimension_semantics<parallel>, #tpu.dimension_semantics<parallel>], iteration_bounds = array<i64: 1, 1>, scalar_prefetch = 0 : i64, scratch_operands = 0 : i64, tpu.core_type = #tpu.core_type<tc>, window_params = [{transform_indices = @transform_0, window_bounds = array<i64: 8, 32>}, {transform_indices = @transform_1, window_bounds = array<i64: 128, 32>}, {transform_indices = @transform_2, window_bounds = array<i64: 8, 1>}, {transform_indices = @transform_3, window_bounds = array<i64: 1, 128>}, {transform_indices = @transform_4, window_bounds = array<i64: 8, 128>}]} {
    %c0 = arith.constant 0 : index
    %c0_0 = arith.constant 0 : index
    %0 = vector.load %arg2[%c0, %c0_0] : memref<8x32xf32, #tpu.memory_space<vmem>>, vector<8x32xf32>
    %c0_1 = arith.constant 0 : index
    %c0_2 = arith.constant 0 : index
    %1 = vector.load %arg3[%c0_1, %c0_2] : memref<128x32xf32, #tpu.memory_space<vmem>>, vector<128x32xf32>
    %cst = arith.constant dense<0.000000e+00> : vector<8x128xf32>
    %2 = tpu.matmul %0, %1, %cst {dimension_numbers = #tpu.dot_dimension_numbers<[1], [1], [0], [0], [0, 0, 1, 0], [], []>} : vector<8x32xf32>, vector<128x32xf32>, vector<8x128xf32> -> vector<8x128xf32>
    %c0_3 = arith.constant 0 : index
    %c0_4 = arith.constant 0 : index
    %3 = vector.load %arg4[%c0_3, %c0_4] : memref<8x1xf32, #tpu.memory_space<vmem>>, vector<8x1xf32>
    %c0_5 = arith.constant 0 : index
    %c0_6 = arith.constant 0 : index
    %4 = vector.load %arg5[%c0_5, %c0_6] : memref<1x128xf32, #tpu.memory_space<vmem>>, vector<1x128xf32>
    %5 = vector.broadcast %3 : vector<8x1xf32> to vector<8x128xf32>
    %6 = vector.broadcast %4 : vector<1x128xf32> to vector<8x128xf32>
    %7 = arith.mulf %5, %6 : vector<8x128xf32>
    %cst_7 = arith.constant 2.000000e+09 : f32
    %8 = vector.broadcast %cst_7 : f32 to vector<8x128xf32>
    %9 = arith.minimumf %7, %8 : vector<8x128xf32>
    %10 = arith.mulf %2, %9 : vector<8x128xf32>
    %c0_8 = arith.constant 0 : index
    %c0_9 = arith.constant 0 : index
    %11 = vector.load %arg6[%c0_8, %c0_9] : memref<8x128xf32, #tpu.memory_space<vmem>>, vector<8x128xf32>
    tpu.vector_store %arg6[%c0_8, %c0_9], %10 {strides = array<i32>} : memref<8x128xf32, #tpu.memory_space<vmem>>, vector<8x128xf32>,
    return
  }
  func.func @transform_0(%arg0: i32, %arg1: i32) -> (i32, i32) {
    %c0_i32 = arith.constant 0 : i32
    %c0_i32_0 = arith.constant 0 : i32
    return %arg0, %c0_i32 : i32, i32
  }
  func.func @transform_1(%arg0: i32, %arg1: i32) -> (i32, i32) {
    %c0_i32 = arith.constant 0 : i32
    %c0_i32_0 = arith.constant 0 : i32
    return %arg1, %c0_i32 : i32, i32
  }
  func.func @transform_2(%arg0: i32, %arg1: i32) -> (i32, i32) {
    %c0_i32 = arith.constant 0 : i32
    %c0_i32_0 = arith.constant 0 : i32
    return %arg0, %c0_i32 : i32, i32
  }
  func.func @transform_3(%arg0: i32, %arg1: i32) -> (i32, i32) {
    %c0_i32 = arith.constant 0 : i32
    %c0_i32_0 = arith.constant 0 : i32
    return %c0_i32, %arg1 : i32, i32
  }
  func.func @transform_4(%arg0: i32, %arg1: i32) -> (i32, i32) {
    %c0_i32 = arith.constant 0 : i32
    return %arg0, %arg1 : i32, i32
  }
}

</mosaic_0001>

<bundles_post_ra>
// kernel: _similarity_impl.1
= control target key start
LH: loop header
LB: loop body
LE: loop exit
PB: predicated region body
PF: predicated region fallthrough
CT: control target
= control target key end

     0   :  { %vm35_vm0 = vcmask 261120   ;;  %v285_v1 = vmov 0.0   ;;  %vm286_vm1 = vmmov 0   ;;  %v287_v2 = vmov 0   ;;  %s391_s0 = inlined_call_operand.vmem [shape: f32[8,32], index: 0, kind: input, shape index: {}]   ;;  %s392_s1 = inlined_call_operand.vmem [shape: f32[128,32], index: 1, kind: input, shape index: {}]   ;;  %s393_s2 = inlined_call_operand.vmem [shape: f32[8,1], index: 2, kind: input, shape index: {}]   ;;  %s394_s3 = inlined_call_operand.vmem [shape: f32[1,128], index: 3, kind: input, shape index: {}]   ;;  %s395_s4 = inlined_call_operand.hbm [shape: f32[8,128], index: 4, kind: output, shape index: {}]  }
   0x1   :  { %v34_v0 = vld [vmem:[%s392_s1 + $0x78] sm:$0xff]  ;;  %223 = vmatprep.subr.mxu0 %v285_v1  ;;  %255 = vmatprep.mubr.msk.f32.mxu0 %vm286_vm1, %v285_v1  ;;  %v33_v3 = vld [vmem:[%s392_s1 + $0x70] sm:$0xff]  ;;  %v157_v4 = vld [vmem:[%s393_s2] sm:$0xff] }
   0x2   :  { %224 = vmatpush3.xpose.msk.msra.mxu0 %vm35_vm0, %v34_v0  ;;  %262 = vset.pattern.permute.xlu0 %v287_v2 }
   0x3   :  { %225 = vmatprep.subr.mxu0 %v285_v1  ;;  %161 = vperm.xlu0 %262, %v157_v4  }
   0x6   :  { %226 = vmatpush3.xpose.msk.msra.mxu0 %vm35_vm0, %v33_v3 }
   0x7   :  { %9 = vsyncpa [#allocation3], 0  ;;  %227 = vmatprep.subr.mxu0 %v285_v1  ;;  %v32_v5 = vld [vmem:[%s392_s1 + $0x68] sm:$0xff]  ;;  %v31_v6 = vld [vmem:[%s392_s1 + $0x60] sm:$0xff]  ;;  %s288_s25 = smov [#allocation2]  }
   0x8   :  { %v30_v7 = vld [vmem:[%s392_s1 + $0x58] sm:$0xff]  ;;  %v29_v8 = vld [vmem:[%s392_s1 + $0x50] sm:$0xff]  ;;  %v28_v9 = vld [vmem:[%s392_s1 + $0x48] sm:$0xff]  ;;  %s180_s26 = sshll.u32 %s288_s25, 4  ;;  %s181_s26 = int_to_ptr.vmem [resolvable:$true] %s180_s26 }
   0x9   :  { %v27_v10 = vld [vmem:[%s392_s1 + $0x40] sm:$0xff]  ;;  %v26_v11 = vld [vmem:[%s392_s1 + $0x38] sm:$0xff]  ;;  %v25_v12 = vld [vmem:[%s392_s1 + $0x30] sm:$0xff]  ;;  %p268_p1 = scmp.lt.s32.totalorder %s181_s26, %s181_s26 }
   0xa   :  { %228 = vmatpush3.xpose.msk.msra.mxu0 %vm35_vm0, %v32_v5  ;;  %v24_v13 = vld [vmem:[%s392_s1 + $0x28] sm:$0xff]  ;;  %v23_v14 = vld [vmem:[%s392_s1 + $0x20] sm:$0xff]  ;;  %v22_v15 = vld [vmem:[%s392_s1 + $0x18] sm:$0xff] }
   0xb   :  { %229 = vmatprep.subr.mxu0 %v285_v1  ;;  %v21_v16 = vld [vmem:[%s392_s1 + $0x10] sm:$0xff]  ;;  %v20_v17 = vld [vmem:[%s392_s1 + $0x8] sm:$0xff]  ;;  %v19_v18 = vld [vmem:[%s392_s1] sm:$0xff]  ;;  %s263_s1 = scalar_lea.vmem %s181_s26, 128 }
   0xc   :  { %v18_v19 = vld [vmem:[%s391_s0] sm:$0xff]  ;;  %p264_p0 = scmp.ne.s32.totalorder %s181_s26, %s263_s1  ;;  %p269_p2 = scmp.lt.s32.totalorder %s263_s1, %s263_s1 }
   0xd   :  { %v205_v20 = vld [vmem:[%s394_s3] ss:$0 sm:$0xff] }
   0xe   :  { %230 = vmatpush3.xpose.msk.msra.mxu0 %vm35_vm0, %v31_v6  ;;  %p270_p3 = por %p269_p2, %p268_p1 }
   0xf   :  { %231 = vmatprep.subr.mxu0 %v285_v1 }
  0x10   :  { %p271_p4 = pnand %p270_p3, %p264_p0 }
  0x12   :  { %232 = vmatpush3.xpose.msk.msra.mxu0 %vm35_vm0, %v30_v7 }
  0x13   :  { %233 = vmatprep.subr.mxu0 %v285_v1 }
  0x16   :  { %234 = vmatpush3.xpose.msk.msra.mxu0 %vm35_vm0, %v29_v8 }
  0x17   :  { %235 = vmatprep.subr.mxu0 %v285_v1 }
  0x1a   :  { %236 = vmatpush3.xpose.msk.msra.mxu0 %vm35_vm0, %v28_v9 }
  0x1b   :  { %237 = vmatprep.subr.mxu0 %v285_v1 }
  0x1e   :  { %238 = vmatpush3.xpose.msk.msra.mxu0 %vm35_vm0, %v27_v10 }
  0x1f   :  { %239 = vmatprep.subr.mxu0 %v285_v1 }
  0x22   :  { %240 = vmatpush3.xpose.msk.msra.mxu0 %vm35_vm0, %v26_v11 }
  0x23   :  { %241 = vmatprep.subr.mxu0 %v285_v1 }
  0x26   :  { %242 = vmatpush3.xpose.msk.msra.mxu0 %vm35_vm0, %v25_v12 }
  0x27   :  { %243 = vmatprep.subr.mxu0 %v285_v1 }
  0x2a   :  { %244 = vmatpush3.xpose.msk.msra.mxu0 %vm35_vm0, %v24_v13 }
  0x2b   :  { %245 = vmatprep.subr.mxu0 %v285_v1 }
  0x2e   :  { %246 = vmatpush3.xpose.msk.msra.mxu0 %vm35_vm0, %v23_v14 }
  0x2f   :  { %247 = vmatprep.subr.mxu0 %v285_v1 }
  0x32   :  { %248 = vmatpush3.xpose.msk.msra.mxu0 %vm35_vm0, %v22_v15 }
  0x33   :  { %249 = vmatprep.subr.mxu0 %v285_v1 }
  0x36   :  { %250 = vmatpush3.xpose.msk.msra.mxu0 %vm35_vm0, %v21_v16 }
  0x37   :  { %251 = vmatprep.subr.mxu0 %v285_v1 }
  0x3a   :  { %252 = vmatpush3.xpose.msk.msra.mxu0 %vm35_vm0, %v20_v17 }
  0x3b   :  { %253 = vmatprep.subr.mxu0 %v285_v1 }
  0x3e   :  { %254 = vmatpush3.xpose.msk.msra.mxu0 %vm35_vm0, %v19_v18 }
  0x41   :  { %256 = vmatmul.mubr.msk.f32.vlgmr.msra.gmra.mxu0 %vm35_vm0, %v18_v19 }
  0x7e   :  { %v162_v21 = vpop.permute.xlu0 %161 }
  0x7f   :  { %v170_v22 = vmul.f32 %v205_v20, %v162_v21 }
  0x81   :  { %v171_v23 = vmin.f32 %v170_v22, 2e+09 }
 0x101   :  { %v153_v24 = vpop.f32.mrf.mxu0 }
 0x102   :  { %v172_v25 = vmul.f32 %v171_v23, %v153_v24 }
 0x103   :  { %v257_v26 = vpop.f32.mrf.mxu0 }
 0x104   :  { %173 = vst [vmem:[#allocation2] sm:$0xff] %v172_v25 }
 0x105   :  { %274 = shalt.err (!%p271_p4)
}
 0x106   :  { %183 = dma.vmem_to_hbm [thread:$0]  %s181_s26, 128, %s395_s4, [#allocation3]  }
 0x107   :  { %283 = dma.done.wait [#allocation3], 128  }
 0x108   :  { %284 = vsyncadd [#allocation3], 4294967168 }
 0x109   :  { %187 = vsyncpa [#allocation3], 1 }

</bundles_post_ra>
